<compile_context>
chip_gen: v7x
topology: tpu7x:2x2x1
jax: 0.10.0
libtpu: 0.0.40
codegen_flags: <defaults>
</compile_context>

<pallas_src>
import functools

import jax
import jax.numpy as jnp
from jax.experimental import pallas as pl
from jax.experimental.pallas import tpu as pltpu

NUM_TARGETS = 7
_SUBLANES = 8
_LANES = 128


def _round_up(x, m):
    return ((x + m - 1) // m) * m


def _pcc_loss_kernel(yp_ref, yt_ref, out_ref,
                     sp_ref, st_ref, spp_ref, stt_ref, spt_ref,
                     *, inv_n, inv_nm1):
    k = pl.program_id(0)

    @pl.when(k == 0)
    def _init():
        sp_ref[...] = jnp.zeros_like(sp_ref)
        st_ref[...] = jnp.zeros_like(st_ref)
        spp_ref[...] = jnp.zeros_like(spp_ref)
        stt_ref[...] = jnp.zeros_like(stt_ref)
        spt_ref[...] = jnp.zeros_like(spt_ref)

    yp = yp_ref[...]            # (8, TB) f32; row 7 and padded lanes are zero
    yt = yt_ref[...]

    # Raw running sums per column (zero padding contributes nothing).
    sp_ref[...] += jnp.sum(yp, axis=1, keepdims=True)
    st_ref[...] += jnp.sum(yt, axis=1, keepdims=True)
    spp_ref[...] += jnp.sum(yp * yp, axis=1, keepdims=True)
    stt_ref[...] += jnp.sum(yt * yt, axis=1, keepdims=True)
    spt_ref[...] += jnp.sum(yp * yt, axis=1, keepdims=True)

    @pl.when(k == pl.num_programs(0) - 1)
    def _finalize():
        sp = sp_ref[...]
        st = st_ref[...]
        mean_p = sp * inv_n
        mean_t = st * inv_n
        # torch.var default is unbiased (divide by N-1); cov uses mean (1/N).
        var_p = (spp_ref[...] - sp * mean_p) * inv_nm1
        var_t = (stt_ref[...] - st * mean_t) * inv_nm1
        cov = (spt_ref[...] - sp * mean_t) * inv_n
        pcc = cov * jax.lax.rsqrt(var_p * var_t)
        # Only the first 7 sublanes are real target columns; row 7 is padding
        # (its 0 * rsqrt(0) NaN is masked out by the select below).
        row = jax.lax.broadcasted_iota(jnp.int32, pcc.shape, 0)
        per_col = jnp.where(row < NUM_TARGETS, 1.0 - pcc, 0.0)
        out_ref[0, 0] = jnp.sum(per_col) * (1.0 / NUM_TARGETS)


def single_pcc_loss(y_pred, y_true, *, block_b=8192):
    """Pallas TPU implementation of Single_PCCLoss.forward.

    y_pred, y_true: [B, 7] arrays (any float dtype). Returns a float32 scalar.
    """
    assert y_pred.shape == y_true.shape
    B, C = y_pred.shape
    assert C == NUM_TARGETS
    assert B >= 2, "unbiased variance needs at least 2 samples"

    # NOTE(perf): for tiny batches (a few dozen rows) the fixed pallas_call
    # cost dominates; a plain jnp computation fused into the surrounding jit
    # is then preferable.  The kernel targets large, HBM-bound batches.

    # Lane-dense layout: [B, 7] -> [7, B] -> zero-pad to [8, Bp].
    tb = min(_round_up(block_b, _LANES), _round_up(B, _LANES))
    bp = _round_up(B, tb)
    pad = ((0, _SUBLANES - NUM_TARGETS), (0, bp - B))
    yp = jnp.pad(jnp.transpose(y_pred.astype(jnp.float32)), pad)
    yt = jnp.pad(jnp.transpose(y_true.astype(jnp.float32)), pad)

    num_tiles = bp // tb
    kernel = functools.partial(
        _pcc_loss_kernel,
        inv_n=1.0 / float(B),
        inv_nm1=1.0 / float(B - 1),
    )

    out = pl.pallas_call(
        kernel,
        out_shape=jax.ShapeDtypeStruct((1, 1), jnp.float32),
        grid=(num_tiles,),
        in_specs=[
            pl.BlockSpec((_SUBLANES, tb), lambda k: (0, k)),
            pl.BlockSpec((_SUBLANES, tb), lambda k: (0, k)),
        ],
        out_specs=pl.BlockSpec((1, 1), lambda k: (0, 0),
                               memory_space=pltpu.SMEM),
        scratch_shapes=[pltpu.VMEM((_SUBLANES, 1), jnp.float32)] * 5,
        compiler_params=pltpu.CompilerParams(
            dimension_semantics=("arbitrary",),
        ),
    )(yp, yt)
    return out[0, 0]


def _reference(y_pred, y_true):
    """Pure-JAX reference reproducing the PyTorch loop exactly."""
    n = y_pred.shape[0]
    losses = []
    for i in range(NUM_TARGETS):
        p = y_pred[:, i].astype(jnp.float32)
        t = y_true[:, i].astype(jnp.float32)
        mp, mt = jnp.mean(p), jnp.mean(t)
        vp = jnp.sum((p - mp) ** 2) / (n - 1)
        vt = jnp.sum((t - mt) ** 2) / (n - 1)
        cov = jnp.mean((p - mp) * (t - mt))
        pcc = cov / (jnp.sqrt(vp) * jnp.sqrt(vt))
        losses.append(1.0 - pcc)
    return sum(losses) / NUM_TARGETS


if __name__ == "__main__":
    key = jax.random.PRNGKey(0)
    k1, k2, k3, k4 = jax.random.split(key, 4)

    # Case 1: tiny batch (the module's typical shape); single grid step.
    B0 = 8
    yp0 = jax.random.normal(k1, (B0, NUM_TARGETS), dtype=jnp.float32)
    yt0 = 0.5 * yp0 + jax.random.normal(k2, (B0, NUM_TARGETS), dtype=jnp.float32)
    loss0 = single_pcc_loss(yp0, yt0)
    jax.block_until_ready(loss0)
    ref0 = _reference(yp0, yt0)
    assert jnp.allclose(loss0, ref0, atol=1e-4, rtol=1e-4), (loss0, ref0)

    # Case 2: larger batch, not a multiple of the tile, to exercise the tiled
    # accumulation + zero-padding path (4 grid steps at block_b=256).
    B1 = 1000
    yp1 = jax.random.normal(k3, (B1, NUM_TARGETS), dtype=jnp.float32)
    yt1 = 0.5 * yp1 + jax.random.normal(k4, (B1, NUM_TARGETS), dtype=jnp.float32)
    loss1 = single_pcc_loss(yp1, yt1, block_b=256)
    jax.block_until_ready(loss1)
    ref1 = _reference(yp1, yt1)
    assert jnp.allclose(loss1, ref1, atol=1e-4, rtol=1e-4), (loss1, ref1)

    print("KERNEL_OK")
</pallas_src>

<mosaic_0001>
module attributes {stable_mosaic.version = 11 : i64} {
  func.func @_pcc_loss_kernel(%arg0: i32, %arg1: memref<8x128xf32, #tpu.memory_space<vmem>>, %arg2: memref<8x128xf32, #tpu.memory_space<vmem>>, %arg3: memref<1x1xf32, #tpu.memory_space<smem>>, %arg4: memref<8x1xf32, #tpu.memory_space<vmem>>, %arg5: memref<8x1xf32, #tpu.memory_space<vmem>>, %arg6: memref<8x1xf32, #tpu.memory_space<vmem>>, %arg7: memref<8x1xf32, #tpu.memory_space<vmem>>, %arg8: memref<8x1xf32, #tpu.memory_space<vmem>>) attributes {dimension_semantics = [#tpu.dimension_semantics<arbitrary>], iteration_bounds = array<i64: 1>, scalar_prefetch = 0 : i64, scratch_operands = 5 : i64, tpu.core_type = #tpu.core_type<tc>, window_params = [{transform_indices = @transform_0, window_bounds = array<i64: 8, 128>}, {transform_indices = @transform_1, window_bounds = array<i64: 8, 128>}, {transform_indices = @transform_2, window_bounds = array<i64: 1, 1>}]} {
    %c0_i32 = arith.constant 0 : i32
    %0 = arith.cmpi eq, %arg0, %c0_i32 : i32
    %1 = arith.extui %0 : i1 to i32
    %c0_i32_0 = arith.constant 0 : i32
    %2 = arith.cmpi ne, %1, %c0_i32_0 : i32
    scf.if %2 {
      %cst_30 = arith.constant 0.000000e+00 : f32
      %36 = vector.broadcast %cst_30 : f32 to vector<8x1xf32>
      %c0_31 = arith.constant 0 : index
      %c0_32 = arith.constant 0 : index
      %37 = vector.load %arg4[%c0_31, %c0_32] : memref<8x1xf32, #tpu.memory_space<vmem>>, vector<8x1xf32>
      tpu.vector_store %arg4[%c0_31, %c0_32], %36 {strides = array<i32>} : memref<8x1xf32, #tpu.memory_space<vmem>>, vector<8x1xf32>,
      %cst_33 = arith.constant 0.000000e+00 : f32
      %38 = vector.broadcast %cst_33 : f32 to vector<8x1xf32>
      %c0_34 = arith.constant 0 : index
      %c0_35 = arith.constant 0 : index
      %39 = vector.load %arg5[%c0_34, %c0_35] : memref<8x1xf32, #tpu.memory_space<vmem>>, vector<8x1xf32>
      tpu.vector_store %arg5[%c0_34, %c0_35], %38 {strides = array<i32>} : memref<8x1xf32, #tpu.memory_space<vmem>>, vector<8x1xf32>,
      %cst_36 = arith.constant 0.000000e+00 : f32
      %40 = vector.broadcast %cst_36 : f32 to vector<8x1xf32>
      %c0_37 = arith.constant 0 : index
      %c0_38 = arith.constant 0 : index
      %41 = vector.load %arg6[%c0_37, %c0_38] : memref<8x1xf32, #tpu.memory_space<vmem>>, vector<8x1xf32>
      tpu.vector_store %arg6[%c0_37, %c0_38], %40 {strides = array<i32>} : memref<8x1xf32, #tpu.memory_space<vmem>>, vector<8x1xf32>,
      %cst_39 = arith.constant 0.000000e+00 : f32
      %42 = vector.broadcast %cst_39 : f32 to vector<8x1xf32>
      %c0_40 = arith.constant 0 : index
      %c0_41 = arith.constant 0 : index
      %43 = vector.load %arg7[%c0_40, %c0_41] : memref<8x1xf32, #tpu.memory_space<vmem>>, vector<8x1xf32>
      tpu.vector_store %arg7[%c0_40, %c0_41], %42 {strides = array<i32>} : memref<8x1xf32, #tpu.memory_space<vmem>>, vector<8x1xf32>,
      %cst_42 = arith.constant 0.000000e+00 : f32
      %44 = vector.broadcast %cst_42 : f32 to vector<8x1xf32>
      %c0_43 = arith.constant 0 : index
      %c0_44 = arith.constant 0 : index
      %45 = vector.load %arg8[%c0_43, %c0_44] : memref<8x1xf32, #tpu.memory_space<vmem>>, vector<8x1xf32>
      tpu.vector_store %arg8[%c0_43, %c0_44], %44 {strides = array<i32>} : memref<8x1xf32, #tpu.memory_space<vmem>>, vector<8x1xf32>,
    } else {
    }
    %c0 = arith.constant 0 : index
    %c0_1 = arith.constant 0 : index
    %3 = vector.load %arg1[%c0, %c0_1] : memref<8x128xf32, #tpu.memory_space<vmem>>, vector<8x128xf32>
    %c0_2 = arith.constant 0 : index
    %c0_3 = arith.constant 0 : index
    %4 = vector.load %arg2[%c0_2, %c0_3] : memref<8x128xf32, #tpu.memory_space<vmem>>, vector<8x128xf32>
    %c0_4 = arith.constant 0 : index
    %c0_5 = arith.constant 0 : index
    %5 = vector.load %arg4[%c0_4, %c0_5] : memref<8x1xf32, #tpu.memory_space<vmem>>, vector<8x1xf32>
    %cst = arith.constant dense<0.000000e+00> : vector<8xf32>
    %6 = vector.multi_reduction <add>, %3, %cst [1] : vector<8x128xf32> to vector<8xf32>
    %7 = vector.shape_cast %6 : vector<8xf32> to vector<8x1xf32>
    %8 = arith.addf %5, %7 : vector<8x1xf32>
    %c0_6 = arith.constant 0 : index
    %c0_7 = arith.constant 0 : index
    %9 = vector.load %arg4[%c0_6, %c0_7] : memref<8x1xf32, #tpu.memory_space<vmem>>, vector<8x1xf32>
    tpu.vector_store %arg4[%c0_6, %c0_7], %8 {strides = array<i32>} : memref<8x1xf32, #tpu.memory_space<vmem>>, vector<8x1xf32>,
    %c0_8 = arith.constant 0 : index
    %c0_9 = arith.constant 0 : index
    %10 = vector.load %arg5[%c0_8, %c0_9] : memref<8x1xf32, #tpu.memory_space<vmem>>, vector<8x1xf32>
    %cst_10 = arith.constant dense<0.000000e+00> : vector<8xf32>
    %11 = vector.multi_reduction <add>, %4, %cst_10 [1] : vector<8x128xf32> to vector<8xf32>
    %12 = vector.shape_cast %11 : vector<8xf32> to vector<8x1xf32>
    %13 = arith.addf %10, %12 : vector<8x1xf32>
    %c0_11 = arith.constant 0 : index
    %c0_12 = arith.constant 0 : index
    %14 = vector.load %arg5[%c0_11, %c0_12] : memref<8x1xf32, #tpu.memory_space<vmem>>, vector<8x1xf32>
    tpu.vector_store %arg5[%c0_11, %c0_12], %13 {strides = array<i32>} : memref<8x1xf32, #tpu.memory_space<vmem>>, vector<8x1xf32>,
    %c0_13 = arith.constant 0 : index
    %c0_14 = arith.constant 0 : index
    %15 = vector.load %arg6[%c0_13, %c0_14] : memref<8x1xf32, #tpu.memory_space<vmem>>, vector<8x1xf32>
    %16 = arith.mulf %3, %3 : vector<8x128xf32>
    %cst_15 = arith.constant dense<0.000000e+00> : vector<8xf32>
    %17 = vector.multi_reduction <add>, %16, %cst_15 [1] : vector<8x128xf32> to vector<8xf32>
    %18 = vector.shape_cast %17 : vector<8xf32> to vector<8x1xf32>
    %19 = arith.addf %15, %18 : vector<8x1xf32>
    %c0_16 = arith.constant 0 : index
    %c0_17 = arith.constant 0 : index
    %20 = vector.load %arg6[%c0_16, %c0_17] : memref<8x1xf32, #tpu.memory_space<vmem>>, vector<8x1xf32>
    tpu.vector_store %arg6[%c0_16, %c0_17], %19 {strides = array<i32>} : memref<8x1xf32, #tpu.memory_space<vmem>>, vector<8x1xf32>,
    %c0_18 = arith.constant 0 : index
    %c0_19 = arith.constant 0 : index
    %21 = vector.load %arg7[%c0_18, %c0_19] : memref<8x1xf32, #tpu.memory_space<vmem>>, vector<8x1xf32>
    %22 = arith.mulf %4, %4 : vector<8x128xf32>
    %cst_20 = arith.constant dense<0.000000e+00> : vector<8xf32>
    %23 = vector.multi_reduction <add>, %22, %cst_20 [1] : vector<8x128xf32> to vector<8xf32>
    %24 = vector.shape_cast %23 : vector<8xf32> to vector<8x1xf32>
    %25 = arith.addf %21, %24 : vector<8x1xf32>
    %c0_21 = arith.constant 0 : index
    %c0_22 = arith.constant 0 : index
    %26 = vector.load %arg7[%c0_21, %c0_22] : memref<8x1xf32, #tpu.memory_space<vmem>>, vector<8x1xf32>
    tpu.vector_store %arg7[%c0_21, %c0_22], %25 {strides = array<i32>} : memref<8x1xf32, #tpu.memory_space<vmem>>, vector<8x1xf32>,
    %c0_23 = arith.constant 0 : index
    %c0_24 = arith.constant 0 : index
    %27 = vector.load %arg8[%c0_23, %c0_24] : memref<8x1xf32, #tpu.memory_space<vmem>>, vector<8x1xf32>
    %28 = arith.mulf %3, %4 : vector<8x128xf32>
    %cst_25 = arith.constant dense<0.000000e+00> : vector<8xf32>
    %29 = vector.multi_reduction <add>, %28, %cst_25 [1] : vector<8x128xf32> to vector<8xf32>
    %30 = vector.shape_cast %29 : vector<8xf32> to vector<8x1xf32>
    %31 = arith.addf %27, %30 : vector<8x1xf32>
    %c0_26 = arith.constant 0 : index
    %c0_27 = arith.constant 0 : index
    %32 = vector.load %arg8[%c0_26, %c0_27] : memref<8x1xf32, #tpu.memory_space<vmem>>, vector<8x1xf32>
    tpu.vector_store %arg8[%c0_26, %c0_27], %31 {strides = array<i32>} : memref<8x1xf32, #tpu.memory_space<vmem>>, vector<8x1xf32>,
    %c0_i32_28 = arith.constant 0 : i32
    %33 = arith.cmpi eq, %arg0, %c0_i32_28 : i32
    %34 = arith.extui %33 : i1 to i32
    %c0_i32_29 = arith.constant 0 : i32
    %35 = arith.cmpi ne, %34, %c0_i32_29 : i32
    scf.if %35 {
      %c0_30 = arith.constant 0 : index
      %c0_31 = arith.constant 0 : index
      %36 = vector.load %arg4[%c0_30, %c0_31] : memref<8x1xf32, #tpu.memory_space<vmem>>, vector<8x1xf32>
      %c0_32 = arith.constant 0 : index
      %c0_33 = arith.constant 0 : index
      %37 = vector.load %arg5[%c0_32, %c0_33] : memref<8x1xf32, #tpu.memory_space<vmem>>, vector<8x1xf32>
      %cst_34 = arith.constant 1.250000e-01 : f32
      %38 = vector.broadcast %cst_34 : f32 to vector<8x1xf32>
      %39 = arith.mulf %36, %38 : vector<8x1xf32>
      %cst_35 = arith.constant 1.250000e-01 : f32
      %40 = vector.broadcast %cst_35 : f32 to vector<8x1xf32>
      %41 = arith.mulf %37, %40 : vector<8x1xf32>
      %c0_36 = arith.constant 0 : index
      %c0_37 = arith.constant 0 : index
      %42 = vector.load %arg6[%c0_36, %c0_37] : memref<8x1xf32, #tpu.memory_space<vmem>>, vector<8x1xf32>
      %43 = arith.mulf %36, %39 : vector<8x1xf32>
      %44 = arith.subf %42, %43 : vector<8x1xf32>
      %cst_38 = arith.constant 0.142857149 : f32
      %45 = vector.broadcast %cst_38 : f32 to vector<8x1xf32>
      %46 = arith.mulf %44, %45 : vector<8x1xf32>
      %c0_39 = arith.constant 0 : index
      %c0_40 = arith.constant 0 : index
      %47 = vector.load %arg7[%c0_39, %c0_40] : memref<8x1xf32, #tpu.memory_space<vmem>>, vector<8x1xf32>
      %48 = arith.mulf %37, %41 : vector<8x1xf32>
      %49 = arith.subf %47, %48 : vector<8x1xf32>
      %cst_41 = arith.constant 0.142857149 : f32
      %50 = vector.broadcast %cst_41 : f32 to vector<8x1xf32>
      %51 = arith.mulf %49, %50 : vector<8x1xf32>
      %c0_42 = arith.constant 0 : index
      %c0_43 = arith.constant 0 : index
      %52 = vector.load %arg8[%c0_42, %c0_43] : memref<8x1xf32, #tpu.memory_space<vmem>>, vector<8x1xf32>
      %53 = arith.mulf %36, %41 : vector<8x1xf32>
      %54 = arith.subf %52, %53 : vector<8x1xf32>
      %cst_44 = arith.constant 1.250000e-01 : f32
      %55 = vector.broadcast %cst_44 : f32 to vector<8x1xf32>
      %56 = arith.mulf %54, %55 : vector<8x1xf32>
      %57 = arith.mulf %46, %51 : vector<8x1xf32>
      %58 = math.rsqrt %57 : vector<8x1xf32>
      %59 = arith.mulf %56, %58 : vector<8x1xf32>
      %60 = tpu.iota {dimensions = array<i32: 0>} : vector<8x1xi32>
      %c7_i32 = arith.constant 7 : i32
      %61 = vector.broadcast %c7_i32 : i32 to vector<8x1xi32>
      %62 = arith.cmpi slt, %60, %61 : vector<8x1xi32>
      %cst_45 = arith.constant 1.000000e+00 : f32
      %63 = vector.broadcast %cst_45 : f32 to vector<8x1xf32>
      %64 = arith.subf %63, %59 : vector<8x1xf32>
      %cst_46 = arith.constant 0.000000e+00 : f32
      %65 = vector.broadcast %cst_46 : f32 to vector<8x1xf32>
      %66 = arith.select %62, %64, %65 : vector<8x1xi1>, vector<8x1xf32>
      %67 = vector.shape_cast %66 : vector<8x1xf32> to vector<1x8x1xf32>
      %cst_47 = arith.constant dense<0.000000e+00> : vector<1xf32>
      %68 = vector.multi_reduction <add>, %67, %cst_47 [1, 2] : vector<1x8x1xf32> to vector<1xf32>
      %69 = vector.shape_cast %68 : vector<1xf32> to vector<1x1x1xf32>
      %70 = vector.extract %69[0, 0, 0] : f32 from vector<1x1x1xf32>
      %cst_48 = arith.constant 0.142857149 : f32
      %71 = arith.mulf %70, %cst_48 : f32
      %c0_49 = arith.constant 0 : index
      %c0_50 = arith.constant 0 : index
      %72 = memref.load %arg3[%c0_49, %c0_50] : memref<1x1xf32, #tpu.memory_space<smem>>
      memref.store %71, %arg3[%c0_49, %c0_50] : memref<1x1xf32, #tpu.memory_space<smem>>
    } else {
    }
    return
  }
  func.func @transform_0(%arg0: i32) -> (i32, i32) {
    %c0_i32 = arith.constant 0 : i32
    %c0_i32_0 = arith.constant 0 : i32
    return %c0_i32, %arg0 : i32, i32
  }
  func.func @transform_1(%arg0: i32) -> (i32, i32) {
    %c0_i32 = arith.constant 0 : i32
    %c0_i32_0 = arith.constant 0 : i32
    return %c0_i32, %arg0 : i32, i32
  }
  func.func @transform_2(%arg0: i32) -> (i32, i32) {
    %c0_i32 = arith.constant 0 : i32
    %c0_i32_0 = arith.constant 0 : i32
    %c0_i32_1 = arith.constant 0 : i32
    return %c0_i32, %c0_i32_0 : i32, i32
  }
}

</mosaic_0001>

<bundles_post_ra>
// kernel: tpu_custom_call.1
= control target key start
LH: loop header
LB: loop body
LE: loop exit
PB: predicated region body
PF: predicated region fallthrough
CT: control target
= control target key end

     0   :  { %7 = vsyncpa [#allocation8], 0  ;;  %s266_s0 = inlined_call_operand.hbm [shape: f32[8,128], index: 0, kind: input, shape index: {}]   ;;  %s267_s1 = inlined_call_operand.hbm [shape: f32[8,128], index: 1, kind: input, shape index: {}]   ;;  %s268_s2 = inlined_call_operand.hbm [shape: f32[1,1], index: 2, kind: output, shape index: {}]  }
   0x1   :  { %8 = vsyncpa [#allocation11], 0 }
   0x2   :  { %9 = vsyncpa [#allocation9], 0  ;;  %s200_s9 = smov [#allocation7]   ;;  %s201_s11 = smov [#allocation10]  }
   0x3   :  { %s16_s10 = sshll.u32 %s200_s9, 4  ;;  %s26_s12 = sshll.u32 %s201_s11, 4  ;;  %s17_s10 = int_to_ptr.vmem [resolvable:$true] %s16_s10  ;;  %s27_s12 = int_to_ptr.vmem [resolvable:$true] %s26_s12 }
   0x4   :  { %s140_s15 = scalar_lea.hbm %s266_s0, 128 }
   0x5   :  { %p141_p0 = scmp.ne.s32.totalorder %s266_s0, %s140_s15  ;;  %p144_p1 = scmp.lt.u32.totalorder %s140_s15, %s266_s0 }
   0x7   :  { %p146_p2 = pnand %p144_p1, %p141_p0 }
   0x9   :  { %149 = shalt.err (!%p146_p2)
}
   0xa   :  { %s150_s20 = scalar_lea.vmem %s17_s10, 128  ;;  %p155_p4 = scmp.lt.s32.totalorder %s17_s10, %s17_s10 }
   0xb   :  { %p151_p3 = scmp.ne.s32.totalorder %s17_s10, %s150_s20  ;;  %p156_p5 = scmp.lt.s32.totalorder %s150_s20, %s150_s20 }
   0xd   :  { %p157_p6 = por %p156_p5, %p155_p4 }
   0xf   :  { %p158_p7 = pnand %p157_p6, %p151_p3 }
  0x11   :  { %161 = shalt.err (!%p158_p7)
}
  0x12   :  { %19 = dma.hbm_to_vmem [thread:$0]  %s266_s0, 128, %s17_s10, [#allocation8]  }
  0x13   :  { %s162_s25 = scalar_lea.hbm %s267_s1, 128 }
  0x14   :  { %p163_p8 = scmp.ne.s32.totalorder %s267_s1, %s162_s25  ;;  %p166_p9 = scmp.lt.u32.totalorder %s162_s25, %s267_s1 }
  0x16   :  { %p168_p10 = pnand %p166_p9, %p163_p8 }
  0x18   :  { %171 = shalt.err (!%p168_p10)
}
  0x19   :  { %s172_s30 = scalar_lea.vmem %s27_s12, 128  ;;  %p177_p12 = scmp.lt.s32.totalorder %s27_s12, %s27_s12 }
  0x1a   :  { %p173_p11 = scmp.ne.s32.totalorder %s27_s12, %s172_s30  ;;  %p178_p13 = scmp.lt.s32.totalorder %s172_s30, %s172_s30 }
  0x1c   :  { %p179_p0 = por %p178_p13, %p177_p12 }
  0x1e   :  { %p180_p1 = pnand %p179_p0, %p173_p11 }
  0x20   :  { %183 = shalt.err (!%p180_p1)
}
  0x21   :  { %29 = dma.hbm_to_vmem [thread:$0]  %s267_s1, 128, %s27_s12, [#allocation11]  }
  0x22   :  { %194 = dma.done.wait [#allocation8], 128  }
  0x23   :  { %195 = vsyncadd [#allocation8], 4294967168 }
  0x24   :  { %196 = dma.done.wait [#allocation11], 128  }
  0x25   :  { %197 = vsyncadd [#allocation11], 4294967168  ;;  %vm40_vm0 = vcmask 7168   ;;  %v202_v0 = vmov 0.0   ;;  %v46_v1 = vld [vmem:[#allocation7] sm:$0xff]  ;;  %v47_v3 = vld [vmem:[#allocation10] sm:$0xff]  ;;  %v99_v36 = vlaneseq }
  0x26   :  { %41 = vst.msk [vmem:[#allocation2] sm:$0xff] %vm40_vm0, %v202_v0  ;;  %42 = vst.msk [vmem:[#allocation3] sm:$0xff] %vm40_vm0, %v202_v0  ;;  %49 = vadd.xlane.f32.xlu0 %v46_v1  ;;  %v60_v2 = vmul.f32 %v46_v1, %v46_v1  ;;  %v66_v4 = vmul.f32 %v47_v3, %v47_v3  ;;  %v72_v5 = vmul.f32 %v47_v3, %v46_v1  ;;  %s184_s7 = scalar_lea.hbm %s268_s2, 16 }
  0x27   :  { %43 = vst.msk [vmem:[#allocation4] sm:$0xff] %vm40_vm0, %v202_v0  ;;  %44 = vst.msk [vmem:[#allocation5] sm:$0xff] %vm40_vm0, %v202_v0  ;;  %v100_v38 = vshrl.u32 %v99_v36, 7  ;;  %p185_p2 = scmp.ne.s32.totalorder %s268_s2, %s184_s7  ;;  %p188_p3 = scmp.lt.u32.totalorder %s184_s7, %s268_s2 }
  0x28   :  { %45 = vst.msk [vmem:[#allocation6] sm:$0xff] %vm40_vm0, %v202_v0  ;;  %61 = vadd.xlane.f32.xlu1 %v60_v2 }
  0x29   :  { %vm101_vm1 = vcmp.lt.s32.totalorder %v100_v38, 7  ;;  %p190_p4 = pnand %p188_p3, %p185_p2 }
  0x2a   :  { %55 = vadd.xlane.f32.xlu0 %v47_v3 }
  0x2c   :  { %67 = vadd.xlane.f32.xlu1 %v66_v4 }
  0x2d   :  { %v48_v6 = vld [vmem:[#allocation2] sm:$0xff]  ;;  %v54_v10 = vld [vmem:[#allocation3] sm:$0xff] }
  0x2e   :  { %73 = vadd.xlane.f32.xlu0 %v72_v5  ;;  %v59_v8 = vld [vmem:[#allocation4] sm:$0xff]  ;;  %v65_v14 = vld [vmem:[#allocation5] sm:$0xff] }
  0x2f   :  { %v71_v16 = vld [vmem:[#allocation6] sm:$0xff] }
  0xb3   :  { %v50_v7 = vpop.xlane.xlu0 %49 }
  0xb4   :  { %v51_v9 = vadd.f32 %v50_v7, %v48_v6 }
  0xb5   :  { %v62_v11 = vpop.xlane.xlu1 %61 }
  0xb6   :  { %53 = vst.msk [vmem:[#allocation2] sm:$0xff] %vm40_vm0, %v51_v9  ;;  %v63_v12 = vadd.f32 %v62_v11, %v59_v8 }
  0xb7   :  { %v56_v13 = vpop.xlane.xlu0 %55 }
  0xb8   :  { %v57_v15 = vadd.f32 %v56_v13, %v54_v10  ;;  %64 = vst.msk [vmem:[#allocation4] sm:$0xff] %vm40_vm0, %v63_v12 }
  0xb9   :  { %v68_v17 = vpop.xlane.xlu1 %67 }
  0xba   :  { %58 = vst.msk [vmem:[#allocation3] sm:$0xff] %vm40_vm0, %v57_v15  ;;  %v69_v18 = vadd.f32 %v68_v17, %v65_v14 }
  0xbb   :  { %v74_v19 = vpop.xlane.xlu0 %73 }
  0xbc   :  { %v75_v20 = vadd.f32 %v74_v19, %v71_v16  ;;  %70 = vst.msk [vmem:[#allocation5] sm:$0xff] %vm40_vm0, %v69_v18 }
  0xbd   :  { %v80_v21 = vld [vmem:[#allocation2] sm:$0xff] }
  0xbe   :  { %76 = vst.msk [vmem:[#allocation6] sm:$0xff] %vm40_vm0, %v75_v20  ;;  %v82_v22 = vmul.f32 0.125, %v80_v21 }
  0xbf   :  { %v84_v25 = vld [vmem:[#allocation4] sm:$0xff] }
  0xc0   :  { %v85_v23 = vmul.f32 %v82_v22, %v80_v21 }
  0xc1   :  { %v81_v24 = vld [vmem:[#allocation3] sm:$0xff] }
  0xc2   :  { %v83_v26 = vmul.f32 0.125, %v81_v24  ;;  %v86_v28 = vsub.f32 %v84_v25, %v85_v23 }
  0xc3   :  { %v88_v27 = vld [vmem:[#allocation5] sm:$0xff] }
  0xc4   :  { %v89_v29 = vmul.f32 %v83_v26, %v81_v24  ;;  %v87_v31 = vmul.f32 0.14285715, %v86_v28  ;;  %v93_v34 = vmul.f32 %v83_v26, %v80_v21 }
  0xc5   :  { %v92_v35 = vld [vmem:[#allocation6] sm:$0xff] }
  0xc6   :  { %v90_v30 = vsub.f32 %v88_v27, %v89_v29  ;;  %v94_v37 = vsub.f32 %v92_v35, %v93_v34 }
  0xc8   :  { %v91_v32 = vmul.f32 0.14285715, %v90_v30  ;;  %v95_v39 = vmul.f32 0.125, %v94_v37 }
  0xca   :  { %v96_v33 = vmul.f32 %v91_v32, %v87_v31 }
  0xcc   :  { %138 = vrsqrt.f32 %v96_v33 }
  0xd6   :  { %v139_v40 = vpop.eup %138 }
  0xd7   :  { %v98_v41 = vmul.f32 %v139_v40, %v95_v39 }
  0xd9   :  { %v102_v42 = vsub.f32 1.0, %v98_v41 }
  0xdb   :  { %v103_v43 = vsel %vm101_vm1, %v102_v42, 0.0 }
  0xdc   :  { %v104_v44 = vsel %vm40_vm0, %v103_v43, 0.0 }
  0xdd   :  { %105 = vadd.xlane.f32.xlu1 %v104_v44 }
 0x16a   :  { %v106_v45 = vpop.xlane.xlu1 %105 }
 0x16b   :  { %v107_v46 = vrot.slane %v106_v45, 4 }
 0x16d   :  { %v108_v47 = vadd.f32 %v107_v46, %v106_v45 }
 0x16f   :  { %v109_v48 = vrot.slane %v108_v47, 2 }
 0x171   :  { %v110_v49 = vadd.f32 %v109_v48, %v108_v47 }
 0x173   :  { %v111_v50 = vrot.slane %v110_v49, 1 }
 0x175   :  { %v112_v51 = vadd.f32 %v111_v50, %v110_v49 }
 0x177   :  { %132 = vpush %v112_v51 }
 0x1a8   :  { %s133_s1 = spop %132 }
 0x1a9   :  { %s114_s4 = smul.f32 0.14285715, %s133_s1 }
 0x1ab   :  { %116 = sst [smem:[#allocation12]] %s114_s4 }
 0x1ac   :  { %193 = shalt.err (!%p190_p4)
}
 0x1ad   :  { %s203_s12 = smov [#allocation12]  }
 0x1ae   :  { %124 = dma.smem_to_hbm %s203_s12, 16, %s268_s2, [#allocation9]  }
 0x1af   :  { %198 = dma.done.wait [#allocation9], 16  }
 0x1b0   :  { %199 = vsyncadd [#allocation9], 4294967280 }
 0x1b1   :  { %128 = sfence }
 0x1b2   :  { %129 = vsyncpa [#allocation8], 1 }
 0x1b3   :  { %130 = vsyncpa [#allocation11], 1 }
 0x1b4   :  { %131 = vsyncpa [#allocation9], 1 }

</bundles_post_ra>
